<compile_context>
chip_gen: v7x
topology: tpu7x:2x2x1
jax: 0.10.0
libtpu: 0.0.40
codegen_flags: <defaults>
</compile_context>

<pallas_src>
import numpy as np
import jax
import jax.numpy as jnp
from jax.experimental import pallas as pl
from jax.experimental.pallas import tpu as pltpu


# ----------------------------------------------------------------------------
# helpers
# ----------------------------------------------------------------------------
def _round_up(x, m):
    return ((x + m - 1) // m) * m


def _pick_spatial_tile(s, max_tile=2048):
    """Tile over the Ho*Wo spatial (lane) axis.

    Returns (tile, padded_extent).  Prefers an exact 128-multiple divisor up to
    2048; small extents use a single full block; large awkward extents are padded
    up to a multiple of 512 so the per-step footprint is always bounded (v7x-safe).
    """
    for t in (2048, 1024, 512, 256, 128):
        if t <= s and s % t == 0:
            return t, s
    if s <= max_tile:
        return s, s
    t = 512
    return t, _round_up(s, t)


def _pick_row_tile(h, cap=256):
    """Output-row tile for the upsample (multiple of 8 dividing h, else full h)."""
    for t in (256, 128, 64, 32, 16, 8):
        if t <= min(h, cap) and h % t == 0:
            return t
    return h


def _pick_group(n, cap=8):
    """Largest divisor of n that is <= cap (maps per upsample grid step)."""
    g = 1
    for d in range(1, min(n, cap) + 1):
        if n % d == 0:
            g = d
    return g


def _interp_matrix(out_size, in_size):
    """PyTorch-style bilinear (align_corners=False) 1-D interpolation matrix."""
    W = np.zeros((out_size, in_size), dtype=np.float32)
    scale = in_size / out_size
    for o in range(out_size):
        src = (o + 0.5) * scale - 0.5
        src = max(src, 0.0)
        i0 = min(int(np.floor(src)), in_size - 1)
        i1 = min(i0 + 1, in_size - 1)
        lam = min(max(src - i0, 0.0), 1.0)
        W[o, i0] += 1.0 - lam
        W[o, i1] += lam
    return W


def _im2col_3x3_s2_rows(x_nchw, k_pad, s_pad):
    """3x3 / stride-2 / pad-1 patches in channels-as-rows layout.

    Returns (B, Kpad, Spad) bf16 — no transpose, only a reshape of the tap stack.
    """
    B, C, H, W = x_nchw.shape
    Ho, Wo = H // 2, W // 2
    xp = jnp.pad(x_nchw, ((0, 0), (0, 0), (1, 1), (1, 1)))
    cols = []
    for ky in range(3):
        for kx in range(3):
            cols.append(xp[:, :, ky:ky + 2 * Ho:2, kx:kx + 2 * Wo:2])  # (B,C,Ho,Wo)
    p = jnp.stack(cols, axis=2)                     # (B, C, 9, Ho, Wo)
    p = p.reshape(B, C * 9, Ho * Wo)                # (B, K, S) — pure reshape
    p = jnp.pad(p, ((0, 0), (0, k_pad - C * 9), (0, s_pad - Ho * Wo)))
    return p.astype(jnp.bfloat16), (Ho, Wo)


# ----------------------------------------------------------------------------
# Pallas kernels
# ----------------------------------------------------------------------------
def _fused_conv_head_kernel(p_ref, wbbT_ref, bbb_ref, wsh_ref, bsh_ref, o_ref):
    """conv(3x3,s2)+ReLU -> 1x1 head -> sigmoid, one spatial tile, channels-as-rows.

    p_ref    : (Kpad, TSP)    bf16   im2col patches (spatial in lanes)
    wbbT_ref : (Cf_pad, Kpad) bf16   backbone weight (zero-padded)
    bbb_ref  : (Cf_pad, 1)    f32
    wsh_ref  : (Ncls, Cf_pad) bf16   head weight (zero-padded lanes)
    bsh_ref  : (Ncls, 1)      f32
    o_ref    : (Ncls, TSP)    f32    probabilities, channels-as-rows (lane-dense)
    """
    feat_t = jnp.dot(wbbT_ref[...], p_ref[...],
                     preferred_element_type=jnp.float32)            # (Cf_pad, TSP)
    feat_t = jnp.maximum(feat_t + bbb_ref[...], 0.0)
    logits_t = jnp.dot(wsh_ref[...], feat_t.astype(jnp.bfloat16),
                       preferred_element_type=jnp.float32)          # (Ncls, TSP)
    o_ref[...] = jax.nn.sigmoid(logits_t + bsh_ref[...])


def _make_upsample_kernel(G):
    """Separable bilinear upsample, G maps per step, output rows tiled.

    p_ref   : (G, Ho, Wo)  f32   probabilities
    wxT_ref : (Wo, W)      bf16  column interpolation (transposed)
    wy_ref  : (TH, Ho)     bf16  row interpolation, one row tile
    o_ref   : (G, TH, W)   f32
    tmp_ref : (G, Ho, W)   f32   scratch: p @ WxT, computed once per map group
    """
    def kernel(p_ref, wxT_ref, wy_ref, o_ref, tmp_ref):
        @pl.when(pl.program_id(1) == 0)
        def _():
            for g in range(G):
                tmp_ref[g] = jnp.dot(p_ref[g].astype(jnp.bfloat16), wxT_ref[...],
                                     preferred_element_type=jnp.float32)
        wy = wy_ref[...]
        for g in range(G):
            o_ref[g] = jnp.clip(
                jnp.dot(wy, tmp_ref[g].astype(jnp.bfloat16),
                        preferred_element_type=jnp.float32),
                0.0, 1.0)
    return kernel


# ----------------------------------------------------------------------------
# forward
# ----------------------------------------------------------------------------
def mobilevit_deeplabv3_forward(x, w_bb, b_bb, w_sh, b_sh):
    """x: (B, Cin, H, W) f32 NCHW -> (B, num_classes, H, W) f32 NCHW."""
    B, Cin, H, W = x.shape
    Cfeat = w_bb.shape[0]
    Ncls = w_sh.shape[0]

    K = Cin * 9
    Kpad = _round_up(K, 16)          # sublane axis: small padding only (bf16 packing)
    Cf_pad = _round_up(Cfeat, 128)   # lane axis of the (small, VMEM-resident) weight

    # ---- parameter plumbing (channels-as-rows, bf16 MXU operands) ----
    wbbT = w_bb.reshape(Cfeat, K)                                          # (Cf, K)
    wbbT = jnp.pad(wbbT, ((0, Cf_pad - Cfeat), (0, Kpad - K))).astype(jnp.bfloat16)
    bbb = jnp.pad(b_bb.reshape(Cfeat, 1),
                  ((0, Cf_pad - Cfeat), (0, 0))).astype(jnp.float32)       # (Cf_pad, 1)
    wsh = jnp.pad(w_sh.reshape(Ncls, Cfeat),
                  ((0, 0), (0, Cf_pad - Cfeat))).astype(jnp.bfloat16)      # (Ncls, Cf_pad)
    bsh = b_sh.reshape(Ncls, 1).astype(jnp.float32)                        # (Ncls, 1)

    # ---- im2col (JAX side), spatial tile sizing ----
    Ho, Wo = H // 2, W // 2
    S = Ho * Wo
    TSP, Spad = _pick_spatial_tile(S)
    n_sp = Spad // TSP
    patches, _ = _im2col_3x3_s2_rows(x, Kpad, Spad)                        # (B, Kpad, Spad)

    fused_cost = pl.CostEstimate(
        flops=int(2 * B * Spad * (Cf_pad * Kpad + Ncls * Cf_pad)),
        transcendentals=int(B * Ncls * Spad),
        bytes_accessed=int(B * Kpad * Spad * 2 + B * Ncls * Spad * 4
                           + (Cf_pad * Kpad + Ncls * Cf_pad) * 2
                           + (Cf_pad + Ncls) * 4),
    )

    # ---- fused backbone-stage + seg head + sigmoid ----
    probs_t = pl.pallas_call(
        _fused_conv_head_kernel,
        out_shape=jax.ShapeDtypeStruct((B, Ncls, Spad), jnp.float32),
        grid=(B, n_sp),
        in_specs=[
            pl.BlockSpec((None, Kpad, TSP), lambda b, i: (b, 0, i)),
            pl.BlockSpec((Cf_pad, Kpad), lambda b, i: (0, 0)),
            pl.BlockSpec((Cf_pad, 1), lambda b, i: (0, 0)),
            pl.BlockSpec((Ncls, Cf_pad), lambda b, i: (0, 0)),
            pl.BlockSpec((Ncls, 1), lambda b, i: (0, 0)),
        ],
        out_specs=pl.BlockSpec((None, Ncls, TSP), lambda b, i: (b, 0, i)),
        compiler_params=pltpu.CompilerParams(
            dimension_semantics=("parallel", "parallel"),
            vmem_limit_bytes=64 << 20),
        cost_estimate=fused_cost,
    )(patches, wbbT, bbb, wsh, bsh)                                        # (B, Ncls, Spad)

    if Spad != S:
        probs_t = probs_t[:, :, :S]
    n_maps = B * Ncls
    probs_rows = probs_t.reshape(n_maps, Ho, Wo)          # pure reshape, no transpose

    # ---- separable bilinear upsample (align_corners=False) ----
    Wy = jnp.asarray(_interp_matrix(H, Ho)).astype(jnp.bfloat16)     # (H, Ho)
    WxT = jnp.asarray(_interp_matrix(W, Wo).T).astype(jnp.bfloat16)  # (Wo, W)

    G = _pick_group(n_maps)
    TH = _pick_row_tile(H)
    n_row = H // TH

    up_cost = pl.CostEstimate(
        flops=int(2 * n_maps * (Ho * Wo * W + H * Ho * W)),
        transcendentals=0,
        bytes_accessed=int(n_maps * (Ho * Wo + H * W) * 4 + (Wo * W + H * Ho) * 2),
    )

    up = pl.pallas_call(
        _make_upsample_kernel(G),
        out_shape=jax.ShapeDtypeStruct((n_maps, H, W), jnp.float32),
        grid=(n_maps // G, n_row),
        in_specs=[
            pl.BlockSpec((G, Ho, Wo), lambda g, t: (g, 0, 0)),
            pl.BlockSpec((Wo, W), lambda g, t: (0, 0)),
            pl.BlockSpec((TH, Ho), lambda g, t: (t, 0)),
        ],
        out_specs=pl.BlockSpec((G, TH, W), lambda g, t: (g, t, 0)),
        scratch_shapes=[pltpu.VMEM((G, Ho, W), jnp.float32)],
        compiler_params=pltpu.CompilerParams(
            dimension_semantics=("parallel", "arbitrary"),
            vmem_limit_bytes=64 << 20),
        cost_estimate=up_cost,
    )(probs_rows, WxT, Wy)                                                 # (n_maps, H, W)

    return up.reshape(B, Ncls, H, W)


# ----------------------------------------------------------------------------
# Driver
# ----------------------------------------------------------------------------
if __name__ == "__main__":
    key = jax.random.PRNGKey(0)
    k_x, k_w1, k_b1, k_w2, k_b2 = jax.random.split(key, 5)

    B, Cin, H, W = 2, 4, 16, 16
    Cfeat, Ncls = 8, 3

    x = jax.random.normal(k_x, (B, Cin, H, W), dtype=jnp.float32)
    # deterministic synthetic parameters (PyTorch conv weight layouts)
    w_bb = 0.1 * jax.random.normal(k_w1, (Cfeat, Cin, 3, 3), dtype=jnp.float32)
    b_bb = 0.1 * jax.random.normal(k_b1, (Cfeat,), dtype=jnp.float32)
    w_sh = 0.1 * jax.random.normal(k_w2, (Ncls, Cfeat, 1, 1), dtype=jnp.float32)
    b_sh = 0.1 * jax.random.normal(k_b2, (Ncls,), dtype=jnp.float32)

    out = mobilevit_deeplabv3_forward(x, w_bb, b_bb, w_sh, b_sh)
    out = jax.block_until_ready(out)

    assert out.shape == (B, Ncls, H, W), out.shape
    assert bool(jnp.all(jnp.isfinite(out)))
    assert bool(jnp.all((out >= 0.0) & (out <= 1.0)))  # sigmoid then convex interp (clipped)
    print("KERNEL_OK")
</pallas_src>

<mosaic_0001>
module attributes {stable_mosaic.version = 11 : i64} {
  func.func @_fused_conv_head_kernel(%arg0: i32, %arg1: i32, %arg2: memref<1x48x64xbf16, #tpu.memory_space<vmem>>, %arg3: memref<128x48xbf16, #tpu.memory_space<vmem>>, %arg4: memref<128x1xf32, #tpu.memory_space<vmem>>, %arg5: memref<3x128xbf16, #tpu.memory_space<vmem>>, %arg6: memref<3x1xf32, #tpu.memory_space<vmem>>, %arg7: memref<1x3x64xf32, #tpu.memory_space<vmem>>) attributes {dimension_semantics = [#tpu.dimension_semantics<parallel>, #tpu.dimension_semantics<parallel>], iteration_bounds = array<i64: 2, 1>, scalar_prefetch = 0 : i64, scratch_operands = 0 : i64, tpu.core_type = #tpu.core_type<tc>, window_params = [{transform_indices = @transform_0, window_bounds = array<i64: 1, 48, 64>}, {pipeline_mode = #tpu.pipeline_mode<synchronous>, transform_indices = @transform_1, window_bounds = array<i64: 128, 48>}, {pipeline_mode = #tpu.pipeline_mode<synchronous>, transform_indices = @transform_2, window_bounds = array<i64: 128, 1>}, {pipeline_mode = #tpu.pipeline_mode<synchronous>, transform_indices = @transform_3, window_bounds = array<i64: 3, 128>}, {pipeline_mode = #tpu.pipeline_mode<synchronous>, transform_indices = @transform_4, window_bounds = array<i64: 3, 1>}, {transform_indices = @transform_5, window_bounds = array<i64: 1, 3, 64>}]} {
    %c0 = arith.constant 0 : index
    %c0_0 = arith.constant 0 : index
    %0 = vector.load %arg3[%c0, %c0_0] : memref<128x48xbf16, #tpu.memory_space<vmem>>, vector<128x48xbf16>
    %c0_1 = arith.constant 0 : index
    %c0_2 = arith.constant 0 : index
    %c0_3 = arith.constant 0 : index
    %1 = vector.load %arg2[%c0_1, %c0_2, %c0_3] : memref<1x48x64xbf16, #tpu.memory_space<vmem>>, vector<1x48x64xbf16>
    %2 = vector.shape_cast %1 : vector<1x48x64xbf16> to vector<48x64xbf16>
    %cst = arith.constant dense<0.000000e+00> : vector<128x64xf32>
    %3 = tpu.matmul %0, %2, %cst {dimension_numbers = #tpu.dot_dimension_numbers<[1], [0], [0], [1], [0, 0, 1, 1], [], []>} : vector<128x48xbf16>, vector<48x64xbf16>, vector<128x64xf32> -> vector<128x64xf32>
    %c0_4 = arith.constant 0 : index
    %c0_5 = arith.constant 0 : index
    %4 = vector.load %arg4[%c0_4, %c0_5] : memref<128x1xf32, #tpu.memory_space<vmem>>, vector<128x1xf32>
    %5 = vector.broadcast %4 : vector<128x1xf32> to vector<128x64xf32>
    %6 = arith.addf %3, %5 : vector<128x64xf32>
    %cst_6 = arith.constant 0.000000e+00 : f32
    %7 = vector.broadcast %cst_6 : f32 to vector<128x64xf32>
    %8 = arith.maximumf %6, %7 : vector<128x64xf32>
    %c0_7 = arith.constant 0 : index
    %c0_8 = arith.constant 0 : index
    %9 = vector.load %arg5[%c0_7, %c0_8] : memref<3x128xbf16, #tpu.memory_space<vmem>>, vector<3x128xbf16>
    %10 = arith.truncf %8 : vector<128x64xf32> to vector<128x64xbf16>
    %cst_9 = arith.constant dense<0.000000e+00> : vector<3x64xf32>
    %11 = tpu.matmul %9, %10, %cst_9 {dimension_numbers = #tpu.dot_dimension_numbers<[1], [0], [0], [1], [0, 0, 1, 1], [], []>} : vector<3x128xbf16>, vector<128x64xbf16>, vector<3x64xf32> -> vector<3x64xf32>
    %c0_10 = arith.constant 0 : index
    %c0_11 = arith.constant 0 : index
    %12 = vector.load %arg6[%c0_10, %c0_11] : memref<3x1xf32, #tpu.memory_space<vmem>>, vector<3x1xf32>
    %13 = vector.broadcast %12 : vector<3x1xf32> to vector<3x64xf32>
    %14 = arith.addf %11, %13 : vector<3x64xf32>
    %15 = arith.negf %14 : vector<3x64xf32>
    %16 = math.exp %15 : vector<3x64xf32>
    %cst_12 = arith.constant 1.000000e+00 : f32
    %17 = vector.broadcast %cst_12 : f32 to vector<3x64xf32>
    %18 = arith.addf %17, %16 : vector<3x64xf32>
    %19 = arith.divf %17, %18 : vector<3x64xf32>
    %c0_13 = arith.constant 0 : index
    %c0_14 = arith.constant 0 : index
    %c0_15 = arith.constant 0 : index
    %20 = vector.load %arg7[%c0_13, %c0_14, %c0_15] : memref<1x3x64xf32, #tpu.memory_space<vmem>>, vector<1x3x64xf32>
    %21 = vector.shape_cast %20 : vector<1x3x64xf32> to vector<3x64xf32>
    %22 = vector.shape_cast %19 : vector<3x64xf32> to vector<1x3x64xf32>
    tpu.vector_store %arg7[%c0_13, %c0_14, %c0_15], %22 {strides = array<i32>} : memref<1x3x64xf32, #tpu.memory_space<vmem>>, vector<1x3x64xf32>,
    return
  }
  func.func @transform_0(%arg0: i32, %arg1: i32) -> (i32, i32, i32) {
    %c0_i32 = arith.constant 0 : i32
    %c0_i32_0 = arith.constant 0 : i32
    return %arg0, %c0_i32, %arg1 : i32, i32, i32
  }
  func.func @transform_1(%arg0: i32, %arg1: i32) -> (i32, i32) {
    %c0_i32 = arith.constant 0 : i32
    %c0_i32_0 = arith.constant 0 : i32
    %c0_i32_1 = arith.constant 0 : i32
    return %c0_i32, %c0_i32_0 : i32, i32
  }
  func.func @transform_2(%arg0: i32, %arg1: i32) -> (i32, i32) {
    %c0_i32 = arith.constant 0 : i32
    %c0_i32_0 = arith.constant 0 : i32
    %c0_i32_1 = arith.constant 0 : i32
    return %c0_i32, %c0_i32_0 : i32, i32
  }
  func.func @transform_3(%arg0: i32, %arg1: i32) -> (i32, i32) {
    %c0_i32 = arith.constant 0 : i32
    %c0_i32_0 = arith.constant 0 : i32
    %c0_i32_1 = arith.constant 0 : i32
    return %c0_i32, %c0_i32_0 : i32, i32
  }
  func.func @transform_4(%arg0: i32, %arg1: i32) -> (i32, i32) {
    %c0_i32 = arith.constant 0 : i32
    %c0_i32_0 = arith.constant 0 : i32
    %c0_i32_1 = arith.constant 0 : i32
    return %c0_i32, %c0_i32_0 : i32, i32
  }
  func.func @transform_5(%arg0: i32, %arg1: i32) -> (i32, i32, i32) {
    %c0_i32 = arith.constant 0 : i32
    %c0_i32_0 = arith.constant 0 : i32
    return %arg0, %c0_i32, %arg1 : i32, i32, i32
  }
}

</mosaic_0001>

<bundles_post_ra>
// kernel: tpu_custom_call.1
= control target key start
LH: loop header
LB: loop body
LE: loop exit
PB: predicated region body
PF: predicated region fallthrough
CT: control target
= control target key end

     0   :  { %10 = vsyncpa [#allocation3], 0  ;;  %s1652_s0 = inlined_call_operand.hbm [shape: bf16[2,48,64], index: 0, kind: input, shape index: {}]   ;;  %s1653_s1 = inlined_call_operand.hbm [shape: bf16[128,48], index: 1, kind: input, shape index: {}]   ;;  %s1654_s2 = inlined_call_operand.hbm [shape: f32[128,1], index: 2, kind: input, shape index: {}]   ;;  %s1655_s3 = inlined_call_operand.hbm [shape: bf16[3,128], index: 3, kind: input, shape index: {}]   ;;  %s1656_s4 = inlined_call_operand.hbm [shape: f32[3,1], index: 4, kind: input, shape index: {}]   ;;  %s1657_s5 = inlined_call_operand.hbm [shape: f32[2,3,64], index: 5, kind: output, shape index: {}]  }
   0x1   :  { %12 = vsyncpa [#allocation3 + $0x1], 0 }
   0x2   :  { %13 = vsyncpa [#allocation6], 0 }
   0x3   :  { %14 = vsyncpa [#allocation9], 0 }
   0x4   :  { %15 = vsyncpa [#allocation4], 0 }
   0x5   :  { %17 = vsyncpa [#allocation4 + $0x1], 0  ;;  %s1334_s18 = smov 0   ;;  %s1336_s19 = smov 0  }
   0x6   :  { %s1338_s20 = smov 0   ;;  %s1340_s21 = smov 0  }
   0x7   :  { %s1342_s22 = smov 0   ;;  %s1344_s23 = smov 0  }
   0x8 LB: > { %1666 = sst [smem:[#allocation16_spill]] %s1269_s18  ;;  %s826_s24 = sadd.s32 4294967295, %s1289_s23   ;;  %s1289_s23 = sphi %s1344_s23, %s23_s23   ;;  %s1285_s22 = sphi %s1342_s22, %s1691_s22   ;;  %s1281_s21 = sphi %s1340_s21, %s1690_s21   ;;  %s1277_s20 = sphi %s1338_s20, %s1689_s20   ;;  %s1273_s19 = sphi %s1336_s19, %s1688_s19   ;;  %s1269_s18 = sphi %s1334_s18, %s1687_s18  }
   0x9   : > { %s827_s25 = sadd.s32 4294967294, %s1289_s23   ;;  %p57_p0 = scmp.ne.s32.totalorder %s1273_s19, %s1269_s18 }
   0xa   : > { %p1368_p1 = scmp.eq.s32.totalorder %s826_s24, 0  ;;  %p1372_p2 = scmp.eq.s32.totalorder %s826_s24, 1 }
   0xb   : > { %p173_p3 = scmp.eq.s32.totalorder %s827_s25, 1  ;;  %p828_p5 = scmp.ge.s32.totalorder %s1289_s23, 1 }
   0xc   : > { %s1667_s26 = scalar_select %p1368_p1, 1, 0 }
   0xd   : > { %s1668_s27 = scalar_select %p1372_p2, 1, 0 }
   0xe   : > { %p1378_p4 = por %p1368_p1, %p57_p0  ;;  %p1383_p6 = por %p173_p3, %p57_p0 }
   0xf   : > { %p180_p7 = scmp.lt.s32.totalorder %s1289_s23, 3  ;;  %s1291_s6 = smov [#allocation5]  }
  0x10   : > { %s1669_s28 = scalar_select %p1378_p4, 1, 0 }
  0x11   : > { %s1670_s29 = scalar_select %p1383_p6, 1, 0 }
  0x12   : > { %p1388_p8 = pnand %p828_p5, %p180_p7  ;;  %s192_s7 = sshll.u32 %s1291_s6, 4  ;;  %s1392_s7 = int_to_ptr.vmem [resolvable:$true] %s192_s7 }
  0x13   : > { %1671 = sst [smem:[#allocation17_spill]] %s1670_s29  ;;  %s1292_s9 = smov [#allocation8]  }
  0x14   : > { %s1672_s30 = scalar_select %p1388_p8, 1, 0 }
  0x15   : > { %p950_p9 = pneg %p1388_p8  ;;  %s219_s10 = sshll.u32 %s1292_s9, 4  ;;  %s1403_s10 = int_to_ptr.vmem [resolvable:$true] %s219_s10 }
  0x16   : > { %s1293_s11 = smov [#allocation7]   ;;  %s1057_s15 = scalar_lea.hbm %s1653_s1, 1024 }
  0x17   : > { %p1399_p11 = pnand %p950_p9, %p1368_p1  ;;  %s1405_s12 = sshll.u32 %s1293_s11, 4  ;;  %s206_s12 = int_to_ptr.vmem [resolvable:$true] %s1405_s12 }
  0x18   : > { %p1058_p12 = scmp.ne.s32.totalorder %s1653_s1, %s1057_s15  ;;  %p1064_p5 = scmp.lt.u32.totalorder %s1057_s15, %s1653_s1 }
  0x19   : > { %p1415_p13 = pneg %p1399_p11 }
  0x1b   : > { %p1060_p0 = pnand %p1415_p13, %p1058_p12 }
  0x1d   : > { %p1061_p3 = pneg %p1060_p0 }
  0x1f   : > { %p1066_p7 = pnand %p1064_p5, %p1061_p3 }
  0x21   : > { %1069 = shalt.err (!%p1066_p7)
}
  0x22   : > { %s1070_s9 = scalar_lea.vmem %s1392_s7, 1024  ;;  %p1078_p1 = scmp.lt.s32.totalorder %s1392_s7, %s1392_s7 }
  0x23   : > { %p1071_p9 = scmp.ne.s32.totalorder %s1392_s7, %s1070_s9  ;;  %p1079_p4 = scmp.lt.s32.totalorder %s1070_s9, %s1070_s9 }
  0x25   : > { %p1073_p10 = pnand %p1071_p9, %p1415_p13  ;;  %p1080_p12 = por %p1079_p4, %p1078_p1 }
  0x27   : > { %p1074_p6 = pneg %p1073_p10 }
  0x29   : > { %p1081_p0 = pnand %p1080_p12, %p1074_p6 }
  0x2b   : > { %1084 = shalt.err (!%p1081_p0)
}
  0x2c   : > { %s1664_s11 = smov 64   ;;  %s1665_s13 = smov 4  }
  0x2d   : > { %953 = dma.hbm_to_vmem [thread:$0]  (!%p1399_p11), %s1653_s1, 1024, %s1392_s7, [#allocation6], %s1664_s11, %s1664_s11, %s1665_s13  }
  0x2e   : > { %s1085_s25 = scalar_lea.hbm %s1655_s3, 32 }
  0x2f   : > { %p1086_p1 = scmp.ne.s32.totalorder %s1655_s3, %s1085_s25  ;;  %p1092_p10 = scmp.lt.u32.totalorder %s1085_s25, %s1655_s3 }
  0x31   : > { %p1088_p4 = pnand %p1086_p1, %p1415_p13 }
  0x33   : > { %p1089_p6 = pneg %p1088_p4 }
  0x35   : > { %p1094_p3 = pnand %p1092_p10, %p1089_p6 }
  0x37   : > { %1097 = shalt.err (!%p1094_p3)
}
  0x38   : > { %s1098_s7 = scalar_lea.vmem %s1403_s10, 32  ;;  %p1106_p12 = scmp.lt.s32.totalorder %s1403_s10, %s1403_s10 }
  0x39   : > { %p1099_p5 = scmp.ne.s32.totalorder %s1403_s10, %s1098_s7  ;;  %p1107_p0 = scmp.lt.s32.totalorder %s1098_s7, %s1098_s7 }
  0x3b   : > { %p1101_p7 = pnand %p1099_p5, %p1415_p13  ;;  %p1108_p1 = por %p1107_p0, %p1106_p12 }
  0x3d   : > { %p1102_p9 = pneg %p1101_p7 }
  0x3f   : > { %p1109_p4 = pnand %p1108_p1, %p1102_p9 }
  0x41   : > { %1112 = shalt.err (!%p1109_p4)
}
  0x42   : > { %959 = dma.hbm_to_vmem [thread:$0]  (!%p1399_p11), %s1655_s3, 32, %s1403_s10, [#allocation9]  }
  0x43   : > { %s1113_s16 = scalar_lea.hbm %s1654_s2, 2048 }
  0x44   : > { %p1114_p6 = scmp.ne.s32.totalorder %s1654_s2, %s1113_s16  ;;  %p1120_p5 = scmp.lt.u32.totalorder %s1113_s16, %s1654_s2 }
  0x46   : > { %p1116_p10 = pnand %p1114_p6, %p1415_p13 }
  0x48   : > { %p1117_p3 = pneg %p1116_p10 }
  0x4a   : > { %p1122_p7 = pnand %p1120_p5, %p1117_p3 }
  0x4c   : > { %1125 = shalt.err (!%p1122_p7)
}
  0x4d   : > { %s1126_s7 = scalar_lea.vmem %s206_s12, 2048  ;;  %p1134_p1 = scmp.lt.s32.totalorder %s206_s12, %s206_s12 }
  0x4e   : > { %p1127_p9 = scmp.ne.s32.totalorder %s206_s12, %s1126_s7  ;;  %p1135_p4 = scmp.lt.s32.totalorder %s1126_s7, %s1126_s7 }
  0x50   : > { %p1129_p12 = pnand %p1127_p9, %p1415_p13  ;;  %p1136_p8 = por %p1135_p4, %p1134_p1 }
  0x52   : > { %p1130_p0 = pneg %p1129_p12 }
  0x54   : > { %p1137_p2 = pnand %p1136_p8, %p1130_p0 }
  0x56   : > { %1140 = shalt.err (!%p1137_p2)
}
  0x57   : > { %s1296_s10 = smov 128   ;;  %s1297_s18 = smov 8  }
  0x58   : > { %956 = dma.hbm_to_vmem [thread:$0]  (!%p1399_p11), %s1654_s2, 2048, %s206_s12, [#allocation6], %s1296_s10, %s1296_s10, %s1297_s18  }
  0x59   : > { %s1298_s15 = smov [#allocation10]   ;;  %s1141_s6 = scalar_lea.hbm %s1656_s4, 64 }
  0x5a   : > { %s230_s16 = sshll.u32 %s1298_s15, 4  ;;  %p1142_p2 = scmp.ne.s32.totalorder %s1656_s4, %s1141_s6  ;;  %s231_s16 = int_to_ptr.vmem [resolvable:$true] %s230_s16 }
  0x5b   : > { %p1148_p10 = scmp.lt.u32.totalorder %s1141_s6, %s1656_s4 }
  0x5c   : > { %p1144_p8 = pnand %p1142_p2, %p1415_p13 }
  0x5e   : > { %p1145_p6 = pneg %p1144_p8 }
  0x60   : > { %p1150_p3 = pnand %p1148_p10, %p1145_p6 }
  0x62   : > { %1153 = shalt.err (!%p1150_p3)
}
  0x63   : > { %s1154_s12 = scalar_lea.vmem %s231_s16, 64  ;;  %p1162_p12 = scmp.lt.s32.totalorder %s231_s16, %s231_s16 }
  0x64   : > { %p1155_p5 = scmp.ne.s32.totalorder %s231_s16, %s1154_s12  ;;  %p1163_p0 = scmp.lt.s32.totalorder %s1154_s12, %s1154_s12 }
  0x66   : > { %p1157_p7 = pnand %p1155_p5, %p1415_p13  ;;  %p1164_p1 = por %p1163_p0, %p1162_p12 }
  0x68   : > { %p1158_p9 = pneg %p1157_p7 }
  0x6a   : > { %p1165_p4 = pnand %p1164_p1, %p1158_p9 }
  0x6c   : > { %1168 = shalt.err (!%p1165_p4)
}
  0x6d   : > { %962 = dma.hbm_to_vmem [thread:$0]  (!%p1399_p11), %s1656_s4, 64, %s231_s16, [#allocation9]  }
  0x6e   : > { %s35_s24 = sadd.s32 1, %s1285_s22  ;;  %s44_s11 = sadd.s32 1, %s1277_s20 }
  0x6f   : > { %p37_p13 = scmp.ge.s32.totalorder %s35_s24, 2  ;;  %p51_p2 = scmp.ne.s32.totalorder %s1277_s20, %s1273_s19 }
  0x70   : > { %p52_p8 = scmp.eq.s32.totalorder %s1289_s23, 0  ;;  %p975_p6 = scmp.lt.s32.totalorder %s1289_s23, 2 }
  0x71   : > { %s1693_s24 = smov (%p37_p13, %s35_s24), 0  ;;  %p1675_p3 = scmp.ne.s32.totalorder %s1668_s27, 0 }
  0x72   : > { %p53_p10 = por %p52_p8, %p51_p2  ;;  %s39_s13 = ssub.s32 %s1285_s22, %s1693_s24 }
  0x73   : > { %p1509_p5 = por %p1675_p3, %p51_p2  ;;  %s241_s29 = sand.u32 1, %s1277_s20  }
  0x74   : > { %p42_p7 = scmp.eq.s32.totalorder %s39_s13, 0  ;;  %s927_s14 = smul.u32 24, %s241_s29 }
  0x75   : > { %p1516_p11 = pnand %p975_p6, %p53_p10  ;;  %s928_s17 = smul.u32 384, %s1285_s22 }
  0x76   : > { %s1521_s16 = scalar_select %p42_p7, %s1277_s20, %s44_s11  }
  0x77   : > { %s245_s25 = scalar_lea.vmem [#allocation2], %s927_s14  ;;  %s1527_s7 = scalar_lea.hbm %s1652_s0, %s928_s17 }
  0x78   : > { %s253_s6 = sshll.u32 %s245_s25, 4  ;;  %s1531_s12 = scalar_lea.sflag [#allocation3], %s241_s29  ;;  %s1529_s6 = int_to_ptr.vmem [resolvable:$true] %s253_s6 }
  0x79   : > { %s1169_s10 = scalar_lea.hbm %s1527_s7, 384  ;;  %p1171_p12 = pneg %p1516_p11 }
  0x7a   : > { %p1170_p9 = scmp.ne.s32.totalorder %s1527_s7, %s1169_s10  ;;  %s1174_s13 = scalar_lea.hbm %s1652_s0, 768 }
  0x7b   : > { %p1175_p4 = scmp.lt.u32.totalorder %s1527_s7, %s1652_s0  ;;  %p1176_p13 = scmp.lt.u32.totalorder %s1174_s13, %s1169_s10 }
  0x7c   : > { %p1172_p0 = pnand %p1171_p12, %p1170_p9  ;;  %p1178_p8 = scmp.lt.u32.totalorder %s1169_s10, %s1527_s7 }
  0x7d   : > { %p1177_p2 = por %p1176_p13, %p1175_p4 }
  0x7e   : > { %p1173_p1 = pneg %p1172_p0 }
  0x7f   : > { %p1179_p6 = por %p1178_p8, %p1177_p2 }
  0x81   : > { %p1180_p10 = pnand %p1179_p6, %p1173_p1 }
  0x83   : > { %1183 = shalt.err (!%p1180_p10)
}
  0x84   : > { %s1184_s29 = scalar_lea.vmem %s1529_s6, 384  ;;  %s1299_s25 = smov [#allocation2]  }
  0x85   : > { %p1185_p3 = scmp.ne.s32.totalorder %s1529_s6, %s1184_s29  ;;  %s1189_s27 = sshll.u32 %s1299_s25, 4  ;;  %s1190_s27 = int_to_ptr.vmem [resolvable:$false] %s1189_s27 }
  0x86   : > { %s1191_s9 = scalar_lea.vmem %s1190_s27, 768  ;;  %p1192_p0 = scmp.lt.s32.totalorder %s1529_s6, %s1190_s27 }
  0x87   : > { %p1187_p7 = pnand %p1185_p3, %p1171_p12  ;;  %p1193_p4 = scmp.lt.s32.totalorder %s1191_s9, %s1184_s29 }
  0x89   : > { %p1188_p9 = pneg %p1187_p7  ;;  %p1194_p13 = por %p1193_p4, %p1192_p0 }
  0x8b   : > { %p1195_p2 = pnand %p1194_p13, %p1188_p9 }
  0x8d   : > { %1198 = shalt.err (!%p1195_p2)
}
  0x8e   : > { %s1678_s10 = smov 4   ;;  %s1679_s18 = smov 64  }
  0x8f   : > { %966 = dma.hbm_to_vmem [thread:$0]  (!%p1516_p11), %s1527_s7, 384, %s1529_s6, %s1531_s12, %s1679_s18, %s1679_s18, %s1678_s10  }
  0x90   : > { %p1680_p12 = scmp.ne.s32.totalorder %s1672_s30, 0 }
  0x91   : > { %s1565_s11 = sand.u32 (!%p1680_p12), 1, %s1273_s19   ;;  %p1681_p1 = scmp.ne.s32.totalorder (!%p1680_p12), %s1669_s28, 0 }
  0x92   : > { %265 = sbr.rel (%p1680_p12) target bundleno = 679 (0x2a7), region = 40  ;;  %s268_s14 = scalar_lea.sflag (!%p1680_p12), [#allocation3], %s1565_s11 }
  0x93   : > { %s929_s13 = smul.u32 (!%p1680_p12), 24, %s1565_s11 }
  0x95   : > { %s271_s17 = scalar_lea.vmem (!%p1680_p12), [#allocation2], %s929_s13 }
  0x99   : > { %1252 = dma.done.wait (%p1681_p1), %s268_s14, 384  }
  0x9a   : > { %1254 = vsyncadd (%p1681_p1), %s268_s14, 4294966912  ;;  %p1682_p8 = scmp.ne.s32.totalorder %s1667_s26, 0 }
  0x9c   : > { %1256 = dma.done.wait (%p1682_p8), [#allocation6], 3072  }
  0x9d   : > { %1258 = vsyncadd (%p1682_p8), [#allocation6], 4294964224 }
  0x9e   : > { %1260 = dma.done.wait (%p1682_p8), [#allocation9], 96  }
  0x9f   : > { %1262 = vsyncadd (%p1682_p8), [#allocation9], 4294967200  ;;  %v1300_v0 = vmov 0   ;;  %v1042_v1 = vld [vmem:[%s271_s17] sm:$0xff]   ;;  %v1043_v2 = vld [vmem:[%s271_s17 + $0x8] sm:$0xff]   ;;  %vm491_vm0 = vcmask 392192  }
  0xa0   : > { %1040 = vset.pattern.permute.xlu0 %v1300_v0  ;;  %1041 = vset.pattern.permute.xlu1 %v1300_v0  ;;  %v1045_v3 = vld [vmem:[#allocation5] sm:$0xff]   ;;  %v1046_v5 = vld [vmem:[#allocation5 + $0x8] sm:$0xff]   ;;  %v1047_v6 = vld [vmem:[#allocation5 + $0x10] sm:$0xff]   ;;  %v1301_v29 = vmov 0.0   ;;  %vm1302_vm1 = vmmov 0   ;;  %s840_s26 = sshll.u32 %s1565_s11, 2 }
  0xa1   : > { %885 = vmatprep.subr.bf16.mxu0 %v1042_v1  ;;  %v1044_v4 = vld [vmem:[%s271_s17 + $0x10] sm:$0xff]   ;;  %891 = vmatprep.mubr.msk.bf16.mxu0 %vm491_vm0, %v1045_v3  ;;  %v339_v8 = vld [vmem:[#allocation7 + $0x10] sm:$0xff]  ;;  %v338_v9 = vld [vmem:[#allocation7 + $0x8] sm:$0xff]  ;;  %s862_s28 = sshll.u32 %s1281_s21, 6  ;;  %s313_s30 = scalar_lea.vmem [#allocation11], %s840_s26  ;;  %vm690_vm2 = vcmask 518144  }
  0xa2   : > { %886 = vmatpush3.bf16.msra.mxu0 %v1042_v1  ;;  %v337_v7 = vld [vmem:[#allocation7] sm:$0xff]  ;;  %365 = vperm.xlu1 %1041, %v339_v8   ;;  %v340_v10 = vld [vmem:[#allocation7 + $0x18] sm:$0xff]  ;;  %v342_v12 = vld [vmem:[#allocation7 + $0x28] sm:$0xff]  ;;  %s707_s15 = sshll.u32 %s313_s30, 4  ;;  %s1603_s12 = scalar_lea.hbm %s1657_s5, %s862_s28  ;;  %s1605_s15 = int_to_ptr.vmem [resolvable:$true] %s707_s15 }
  0xa3   : > { %887 = vmatprep.subr.bf16.mxu0 %v1043_v2  ;;  %355 = vperm.xlu0 %1040, %v337_v7   ;;  %v341_v11 = vld [vmem:[#allocation7 + $0x20] sm:$0xff]  ;;  %v1048_v13 = vld [vmem:[#allocation5 + $0x18] sm:$0xff]   ;;  %v343_v15 = vld [vmem:[#allocation7 + $0x30] sm:$0xff]  ;;  %s693_s29 = scalar_lea.sflag [#allocation4], %s1565_s11  ;;  %s1199_s25 = scalar_lea.vmem %s1605_s15, 64 }
  0xa4   : > { %v1049_v14 = vld [vmem:[#allocation5 + $0x20] sm:$0xff]   ;;  %v344_v16 = vld [vmem:[#allocation7 + $0x38] sm:$0xff]  ;;  %v346_v18 = vld [vmem:[#allocation7 + $0x48] sm:$0xff]  ;;  %907 = vmatprep.subr.bf16.mxu1 %v1301_v29  ;;  %923 = vmatprep.mubr.msk.bf16.mxu1 %vm1302_vm1, %v1301_v29  ;;  %p1200_p11 = scmp.ne.s32.totalorder %s1605_s15, %s1199_s25  ;;  %s1303_s21 = smov [#allocation11]  }
  0xa5   : > { %v345_v17 = vld [vmem:[#allocation7 + $0x40] sm:$0xff]  ;;  %v1050_v19 = vld [vmem:[#allocation5 + $0x28] sm:$0xff]   ;;  %v1051_v20 = vld [vmem:[#allocation5 + $0x30] sm:$0xff]   ;;  %s1203_s27 = sshll.u32 %s1303_s21, 4  ;;  %s1204_s27 = int_to_ptr.vmem [resolvable:$false] %s1203_s27 }
  0xa6   : > { %888 = vmatpush3.bf16.msra.mxu0 %v1043_v2  ;;  %370 = vperm.xlu1 %1041, %v340_v10   ;;  %v347_v21 = vld [vmem:[#allocation7 + $0x50] sm:$0xff]  ;;  %v348_v22 = vld [vmem:[#allocation7 + $0x58] sm:$0xff]  ;;  %v349_v23 = vld [vmem:[#allocation7 + $0x60] sm:$0xff]  ;;  %p1201_p6 = pnand %p1200_p11, %p1509_p5  ;;  %s1205_s9 = scalar_lea.vmem %s1204_s27, 128 }
  0xa7   : > { %889 = vmatprep.subr.bf16.mxu0 %v1044_v4  ;;  %360 = vperm.xlu0 %1040, %v338_v9   ;;  %v350_v24 = vld [vmem:[#allocation7 + $0x68] sm:$0xff]  ;;  %v1052_v25 = vld [vmem:[#allocation5 + $0x38] sm:$0xff]   ;;  %v351_v26 = vld [vmem:[#allocation7 + $0x70] sm:$0xff]  ;;  %p1206_p3 = scmp.lt.s32.totalorder %s1605_s15, %s1204_s27  ;;  %p1207_p7 = scmp.lt.s32.totalorder %s1205_s9, %s1199_s25 }
  0xa8   : > { %v352_v27 = vld [vmem:[#allocation7 + $0x78] sm:$0xff]  ;;  %v638_v28 = vld [vmem:[#allocation10] sm:$0x7]  ;;  %p1202_p10 = pneg %p1201_p6 }
  0xa9   : > { %p1208_p9 = por %p1207_p7, %p1206_p3 }
  0xaa   : > { %890 = vmatpush3.bf16.msra.mxu0 %v1044_v4  ;;  %380 = vperm.xlu1 %1041, %v342_v12  }
  0xab   : > { %375 = vperm.xlu0 %1040, %v341_v11   ;;  %p1209_p0 = pnand %p1208_p9, %p1202_p10 }
  0xad   : > { %892 = vmatmul.mubr.msk.bf16.vlgmr.msra.gmra.mrb[0].mxu0 %vm491_vm0, %v1046_v5 }
  0xae   : > { %895 = vmatprep.mubr.msk.bf16.mxu0 %vm491_vm0, %v1047_v6  ;;  %390 = vperm.xlu1 %1041, %v344_v16  }
  0xaf   : > { %385 = vperm.xlu0 %1040, %v343_v15  }
  0xb2   : > { %400 = vperm.xlu1 %1041, %v346_v18  }
  0xb3   : > { %395 = vperm.xlu0 %1040, %v345_v17  }
  0xb5   : > { %896 = vmatmul.mubr.msk.bf16.gmra.mrb[4].mxu0 %vm491_vm0, %v1048_v13 }
  0xb6   : > { %899 = vmatprep.mubr.msk.bf16.mxu0 %vm491_vm0, %v1049_v14  ;;  %410 = vperm.xlu1 %1041, %v348_v22  }
  0xb7   : > { %405 = vperm.xlu0 %1040, %v347_v21  }
  0xba   : > { %420 = vperm.xlu1 %1041, %v350_v24  }
  0xbb   : > { %415 = vperm.xlu0 %1040, %v349_v23  }
  0xbd   : > { %900 = vmatmul.mubr.msk.bf16.gmra.mrb[8].mxu0 %vm491_vm0, %v1050_v19 }
  0xbe   : > { %903 = vmatprep.mubr.msk.bf16.mxu0 %vm491_vm0, %v1051_v20  ;;  %430 = vperm.xlu1 %1041, %v352_v27  }
  0xbf   : > { %425 = vperm.xlu0 %1040, %v351_v26  }
  0xc3   : > { %641 = vperm.xlu0 %1040, %v638_v28  }
  0xc5   : > { %904 = vmatmul.mubr.msk.bf16.gmra.mrb[12].mxu0 %vm491_vm0, %v1052_v25 }
 0x121   : > { %v366_v31 = vpop.permute.xlu1 %365 }
 0x122   : > { %v356_v30 = vpop.permute.xlu0 %355 }
 0x125   : > { %v371_v33 = vpop.permute.xlu1 %370 }
 0x126   : > { %v361_v32 = vpop.permute.xlu0 %360 }
 0x129   : > { %v381_v35 = vpop.permute.xlu1 %380 }
 0x12a   : > { %v376_v34 = vpop.permute.xlu0 %375 }
 0x12d   : > { %v391_v40 = vpop.permute.xlu1 %390 }
 0x12e   : > { %v386_v36 = vpop.permute.xlu0 %385 }
 0x131   : > { %v401_v52 = vpop.permute.xlu1 %400 }
 0x132   : > { %v396_v48 = vpop.permute.xlu0 %395 }
 0x135   : > { %v411_v1 = vpop.permute.xlu1 %410 }
 0x136   : > { %v406_v61 = vpop.permute.xlu0 %405 }
 0x139   : > { %v421_v14 = vpop.permute.xlu1 %420 }
 0x13a   : > { %v416_v9 = vpop.permute.xlu0 %415 }
 0x13d   : > { %v431_v26 = vpop.permute.xlu1 %430 }
 0x13e   : > { %v426_v21 = vpop.permute.xlu0 %425 }
 0x180   : > { %v893_v37 = vpop.f32.mrb[0].mxu0 }
 0x181   : > { %v559_v38 = vadd.f32 %v893_v37, %v366_v31  ;;  %v550_v39 = vpop.f32.mrb[1].mxu0 }
 0x182   : > { %v551_v41 = vadd.f32 %v550_v39, %v356_v30  ;;  %v894_v42 = vpop.f32.mrb[2].mxu0  ;;  %v629_v39 = vld [vmem:[#allocation8] sm:$0x3] }
 0x183   : > { %v562_v43 = vadd.f32 %v894_v42, %v371_v33  ;;  %v553_v44 = vpop.f32.mrb[3].mxu0  ;;  %v615_v46 = vmax.f32 %v559_v38, 0.0 }
 0x184   : > { %v554_v45 = vadd.f32 %v553_v44, %v361_v32  ;;  %v613_v49 = vmax.f32 %v551_v41, 0.0 }
 0x185   : > { %v616_v47 = vmax.f32 %v562_v43, 0.0 }
 0x186   : > { %v614_v50 = vmax.f32 %v554_v45, 0.0 }
 0x187   : > { %v631_v51 = vpack.c.bf16 %v616_v47, %v615_v46 }
 0x188   : > { %v897_v53 = vpop.f32.mrb[4].mxu0  ;;  %v630_v54 = vpack.c.bf16 %v614_v50, %v613_v49 }
 0x189   : > { %v575_v55 = vadd.f32 %v897_v53, %v386_v36  ;;  %v566_v56 = vpop.f32.mrb[5].mxu0 }
 0x18a   : > { %v567_v57 = vadd.f32 %v566_v56, %v376_v34  ;;  %v898_v58 = vpop.f32.mrb[6].mxu0  ;;  %908 = vmatpush3.bf16.msra.mxu1 %v630_v54 }
 0x18b   : > { %v578_v59 = vadd.f32 %v898_v58, %v391_v40  ;;  %v569_v60 = vpop.f32.mrb[7].mxu0  ;;  %909 = vmatprep.subr.bf16.mxu1 %v1301_v29  ;;  %v619_v63 = vmax.f32 %v575_v55, 0.0  ;;  %v642_v40 = vpop.permute.xlu0 %641 }
 0x18c   : > { %v570_v62 = vadd.f32 %v569_v60, %v381_v35  ;;  %v617_v2 = vmax.f32 %v567_v57, 0.0 }
 0x18d   : > { %v620_v0 = vmax.f32 %v578_v59, 0.0 }
 0x18e   : > { %v618_v3 = vmax.f32 %v570_v62, 0.0  ;;  %910 = vmatpush3.bf16.msra.mxu1 %v631_v51 }
 0x18f   : > { %v633_v4 = vpack.c.bf16 %v620_v0, %v619_v63  ;;  %911 = vmatprep.subr.bf16.mxu1 %v1301_v29 }
 0x190   : > { %v632_v5 = vpack.c.bf16 %v618_v3, %v617_v2  ;;  %v901_v6 = vpop.f32.mrb[8].mxu0 }
 0x191   : > { %v591_v7 = vadd.f32 %v901_v6, %v406_v61  ;;  %v582_v8 = vpop.f32.mrb[9].mxu0 }
 0x192   : > { %v583_v10 = vadd.f32 %v582_v8, %v396_v48  ;;  %v902_v11 = vpop.f32.mrb[10].mxu0  ;;  %912 = vmatpush3.bf16.msra.mxu1 %v632_v5 }
 0x193   : > { %v594_v12 = vadd.f32 %v902_v11, %v411_v1  ;;  %v585_v13 = vpop.f32.mrb[11].mxu0  ;;  %913 = vmatprep.subr.bf16.mxu1 %v1301_v29  ;;  %v623_v16 = vmax.f32 %v591_v7, 0.0 }
 0x194   : > { %v586_v15 = vadd.f32 %v585_v13, %v401_v52  ;;  %v621_v18 = vmax.f32 %v583_v10, 0.0 }
 0x195   : > { %v624_v17 = vmax.f32 %v594_v12, 0.0 }
 0x196   : > { %v622_v19 = vmax.f32 %v586_v15, 0.0  ;;  %914 = vmatpush3.bf16.msra.mxu1 %v633_v4 }
 0x197   : > { %v635_v20 = vpack.c.bf16 %v624_v17, %v623_v16  ;;  %915 = vmatprep.subr.bf16.mxu1 %v1301_v29 }
 0x198   : > { %v634_v22 = vpack.c.bf16 %v622_v19, %v621_v18  ;;  %v905_v23 = vpop.f32.mrb[12].mxu0 }
 0x199   : > { %v607_v24 = vadd.f32 %v905_v23, %v426_v21  ;;  %v598_v25 = vpop.f32.mrb[13].mxu0 }
 0x19a   : > { %v599_v27 = vadd.f32 %v598_v25, %v416_v9  ;;  %v906_v28 = vpop.f32.mrb[14].mxu0  ;;  %916 = vmatpush3.bf16.msra.mxu1 %v634_v22 }
 0x19b   : > { %v610_v30 = vadd.f32 %v906_v28, %v431_v26  ;;  %v601_v31 = vpop.f32.mrb[15].mxu0  ;;  %917 = vmatprep.subr.bf16.mxu1 %v1301_v29  ;;  %v627_v33 = vmax.f32 %v607_v24, 0.0 }
 0x19c   : > { %v602_v32 = vadd.f32 %v601_v31, %v421_v14  ;;  %v625_v35 = vmax.f32 %v599_v27, 0.0 }
 0x19d   : > { %v628_v34 = vmax.f32 %v610_v30, 0.0 }
 0x19e   : > { %v626_v36 = vmax.f32 %v602_v32, 0.0  ;;  %918 = vmatpush3.bf16.msra.mxu1 %v635_v20 }
 0x19f   : > { %v637_v37 = vpack.c.bf16 %v628_v34, %v627_v33  ;;  %919 = vmatprep.subr.bf16.mxu1 %v1301_v29 }
 0x1a0   : > { %v636_v38 = vpack.c.bf16 %v626_v36, %v625_v35 }
 0x1a2   : > { %920 = vmatpush3.bf16.msra.mxu1 %v636_v38 }
 0x1a3   : > { %921 = vmatprep.subr.bf16.mxu1 %v1301_v29 }
 0x1a6   : > { %922 = vmatpush3.bf16.msra.mxu1 %v637_v37 }
 0x1a9   : > { %924 = vmatmul.mubr.bf16.vlgmr.msra.gmra.mrb[0].mxu1 %v629_v39 }
 0x27c   : > { %v678_v41 = vpop.f32.mrb[0].mxu1 }
 0x27d   : > { %v679_v42 = vadd.f32 %v678_v41, %v642_v40  ;;  %v925_v43 = vpop.f32.mrb[1].mxu1 }
 0x27e   : > { %v681_v44 = vpop.f32.mrb[2].mxu1 }
 0x27f   : > { %v860_v45 = vmul.f32 -1.442695, %v679_v42  ;;  %v926_v46 = vpop.f32.mrb[3].mxu1 }
 0x281   : > { %1053 = vpow2.f32 %v860_v45 }
 0x28b   : > { %v1054_v47 = vpop.eup %1053 }
 0x28c   : > { %v687_v48 = vadd.f32 1.0, %v1054_v47 }
 0x28e   : > { %1055 = vrcp.f32 %v687_v48 }
 0x298   : > { %v1056_v29 = vpop.eup %1055 }
 0x299   : > { %691 = vst.msk [vmem:[%s313_s30] sm:$0x7] %vm690_vm2, %v1056_v29 }
 0x29a   : > { %1212 = shalt.err (!%p1209_p0)
}
 0x29b   : > { %s1213_s10 = scalar_lea.hbm %s1603_s12, 64  ;;  %s1217_s13 = scalar_lea.hbm %s1657_s5, 128 }
 0x29c   : > { %p1214_p4 = scmp.ne.s32.totalorder %s1603_s12, %s1213_s10  ;;  %p1218_p12 = scmp.lt.u32.totalorder %s1603_s12, %s1657_s5 }
 0x29d   : > { %p1219_p1 = scmp.lt.u32.totalorder %s1217_s13, %s1213_s10  ;;  %p1221_p11 = scmp.lt.u32.totalorder %s1213_s10, %s1603_s12 }
 0x29e   : > { %p1215_p13 = pnand %p1214_p4, %p1509_p5 }
 0x29f   : > { %p1220_p8 = por %p1219_p1, %p1218_p12 }
 0x2a0   : > { %p1216_p2 = pneg %p1215_p13 }
 0x2a1   : > { %p1222_p6 = por %p1221_p11, %p1220_p8 }
 0x2a3   : > { %p1223_p10 = pnand %p1222_p6, %p1216_p2 }
 0x2a5   : > { %1226 = shalt.err (!%p1223_p10)
}
 0x2a6   : > { %948 = dma.vmem_to_hbm [thread:$0]  (%p1509_p5), %s1605_s15, 64, %s1603_s12, %s693_s29  }
 0x2a7 PF: > { %s1683_s26 = sld [smem:[#allocation16_spill]]  ;;  %s1684_s28 = sld [smem:[#allocation17_spill]] }
 0x2a8   : > { %p1686_p7 = scmp.ge.s32.totalorder %s1289_s23, 2 }
 0x2ad   : > { %s719_s30 = sand.u32 1, %s1683_s26   ;;  %p1685_p3 = scmp.ne.s32.totalorder %s1684_s28, 0 }
 0x2ae   : > { %s720_s6 = scalar_lea.sflag [#allocation4], %s719_s30 }
 0x2af   : > { %p968_p9 = pnand %p1686_p7, %p1685_p3 }
 0x2b1   : > { %1264 = dma.done.wait (!%p968_p9), %s720_s6, 64  }
 0x2b2   : > { %1266 = vsyncadd (!%p968_p9), %s720_s6, 4294967232  ;;  %s23_s23 = sadd.s32 1, %s1289_s23   ;;  %s1687_s18 = smov %s1273_s19 }
 0x2b3   : > { %p20_p0 = scmp.ge.s32.totalorder %s23_s23, 4   ;;  %s1688_s19 = smov %s1277_s20 }
 0x2b4   : > { %s1689_s20 = smov %s1521_s16  ;;  %s1690_s21 = smov %s1285_s22 }
 0x2b5   : > { %s1691_s22 = smov %s1693_s24  ;;  %22 = sbr.rel (!%p20_p0) target bundleno = 8 (0x8), region = 101 }
 0x2bc   :  { %725 = vsyncpa [#allocation3], 1 }
 0x2bd   :  { %727 = vsyncpa [#allocation3 + $0x1], 1 }
 0x2be   :  { %728 = vsyncpa [#allocation6], 1 }
 0x2bf   :  { %729 = vsyncpa [#allocation9], 1 }
 0x2c0   :  { %730 = vsyncpa [#allocation4], 1 }
 0x2c1   :  { %732 = vsyncpa [#allocation4 + $0x1], 1 }

</bundles_post_ra>
